<compile_context>
chip_gen: v5e
topology: v5e:2x2
jax: 0.10.0
libtpu: 0.0.40
codegen_flags: <defaults>
</compile_context>

<pallas_src>
import math
import numbers
import functools

import jax
import jax.numpy as jnp
import numpy as np
from jax.experimental import pallas as pl
from jax.experimental.pallas import tpu as pltpu


# TODO(synk): only the dim=2 (spatial, F.conv2d) case of the module is
# implemented; the dim=1/3 variants are not needed by the nerf-pytorch caller.


def make_gaussian_weight(channels, kernel_size, sigma, dim=2):
    """Reproduces GaussianSmoothing.__init__ weight construction exactly
    (including the non-standard exp(-((x-mean)/(2*std))**2) formula).
    Used here only to build the XLA reference-conv weight."""
    if isinstance(kernel_size, numbers.Number):
        kernel_size = [kernel_size] * dim
    if isinstance(sigma, numbers.Number):
        sigma = [sigma] * dim
    kernel = jnp.ones((), dtype=jnp.float32)
    meshgrids = jnp.meshgrid(
        *[jnp.arange(size, dtype=jnp.float32) for size in kernel_size],
        indexing="ij",
    )
    for size, std, mgrid in zip(kernel_size, sigma, meshgrids):
        mean = (size - 1) / 2.0
        kernel = kernel * (
            1.0 / (std * math.sqrt(2.0 * math.pi))
            * jnp.exp(-(((mgrid - mean) / (2.0 * std)) ** 2))
        )
    kernel = kernel / jnp.sum(kernel)
    kernel = kernel.reshape((1, 1) + kernel.shape)
    kernel = jnp.tile(kernel, (channels,) + (1,) * (kernel.ndim - 1))
    return kernel  # (C, 1, K, K) for dim=2


def make_gaussian_taps_1d(kernel_size, sigma, dim=2):
    """Separable 1D taps.  The module's normalized 2D kernel is the outer
    product of these per-dim normalized 1D kernels (the sum of an outer
    product factors into the product of sums), so the two-pass conv is
    algebraically identical to the 2D depthwise conv."""
    if isinstance(kernel_size, numbers.Number):
        kernel_size = [kernel_size] * dim
    if isinstance(sigma, numbers.Number):
        sigma = [sigma] * dim
    assert dim == 2, "this Pallas kernel implements the dim=2 (spatial) case"
    taps = []
    for size, std in zip(kernel_size, sigma):
        t = jnp.arange(size, dtype=jnp.float32)
        mean = (size - 1) / 2.0
        g = (1.0 / (std * math.sqrt(2.0 * math.pi))) * jnp.exp(
            -(((t - mean) / (2.0 * std)) ** 2)
        )
        taps.append(g / jnp.sum(g))
    # (2, K): row 0 = vertical (H) taps, row 1 = horizontal (W) taps
    return jnp.stack(taps, axis=0).astype(jnp.float32)


def _toeplitz(taps, in_size, out_size, pad):
    """Banded Toeplitz matrix M (in_size x out_size) with zero padding folded
    in: M[c, j] = taps[c - j + pad] when 0 <= c - j + pad < K, else 0."""
    K = taps.shape[0]
    c = jnp.arange(in_size)[:, None]
    j = jnp.arange(out_size)[None, :]
    k = c - j + pad
    valid = (k >= 0) & (k < K)
    return jnp.where(valid, taps[jnp.clip(k, 0, K - 1)], 0.0).astype(jnp.float32)


def _smooth_kernel(x_ref, th_ref, tv_ref, o_ref, *, G, H, W, Ho, Wo):
    # x_ref:  VMEM (G, H, W)   — G unpadded channel-images
    # th_ref: VMEM (W, Wo)     — horizontal Toeplitz taps (padding folded in)
    # tv_ref: VMEM (Ho, H)     — vertical Toeplitz taps (padding folded in)
    # o_ref:  VMEM (G, Ho, Wo)
    x = x_ref[...].astype(jnp.float32)                       # (G, H, W)
    th = jnp.broadcast_to(th_ref[...], (G, W, Wo))           # shared taps
    tv = jnp.broadcast_to(tv_ref[...], (G, Ho, H))

    # Horizontal pass (contract W) on the MXU.
    h = jnp.einsum('ghw,gwo->gho', x, th,
                   preferred_element_type=jnp.float32)       # (G, H, Wo)
    # Vertical pass (contract H) on the MXU.
    out = jnp.einsum('grh,gho->gro', tv, h,
                     preferred_element_type=jnp.float32)     # (G, Ho, Wo)

    o_ref[...] = out.astype(o_ref.dtype)


def _tile_bytes(shape, itemsize):
    """VMEM footprint including (sublane, lane) physical tiling, with the
    sublane multiple chosen by dtype width (8 for 32-bit, 16 bf16, 32 int8)."""
    sub = {4: 8, 2: 16, 1: 32}.get(int(itemsize), 8)
    s = list(shape)
    if len(s) == 1:
        s = [1] + s
    s[-1] = -(-s[-1] // 128) * 128
    s[-2] = -(-s[-2] // sub) * sub
    n = 1
    for d in s:
        n *= d
    return n * itemsize


def _pick_block_channels(B, H, W, Ho, Wo, io_itemsize, budget_bytes):
    """Largest multiple-of-8 channel-image batch G (<= B rounded up to 8)
    whose double-buffered I/O blocks plus in-kernel f32 intermediates fit the
    VMEM budget.  B need not be divisible by G — the wrapper pads."""
    b_cap = -(-B // 8) * 8
    best = 8
    for G in range(8, b_cap + 1, 8):
        need = (
            2 * _tile_bytes((G, H, W), io_itemsize)       # double-buffered in
            + 2 * _tile_bytes((G, Ho, Wo), io_itemsize)   # double-buffered out
            + _tile_bytes((G, H, W), 4)                   # x (f32)
            + _tile_bytes((G, W, Wo), 4)                  # Th broadcast
            + _tile_bytes((G, Ho, H), 4)                  # Tv broadcast
            + _tile_bytes((G, H, Wo), 4)                  # h intermediate
            + _tile_bytes((G, Ho, Wo), 4)                 # out intermediate
        )
        if need <= budget_bytes:
            best = G
        else:
            break
    return best


def _vmem_capacity_bytes():
    try:
        return int(pltpu.get_tpu_info().vmem_capacity_bytes)
    except Exception:
        return 64 << 20   # conservative (v7x-sized) fallback


def gaussian_smoothing(x, kernel_size, sigma, padding=5):
    """Equivalent of GaussianSmoothing.forward: depthwise conv2d, padding=5,
    implemented as two MXU matmuls per block against banded Toeplitz matrices
    built from the separable 1D Gaussian taps (padding folded in)."""
    N, C, H, W = x.shape
    taps = make_gaussian_taps_1d(kernel_size, sigma, dim=2)   # (2, K)
    K = int(taps.shape[-1])
    pad = int(padding)
    Ho = H + 2 * pad - K + 1
    Wo = W + 2 * pad - K + 1
    B = N * C

    th = _toeplitz(taps[1], W, Wo, pad)        # (W, Wo)  horizontal
    tv = _toeplitz(taps[0], H, Ho, pad).T      # (Ho, H)  vertical

    # Generation-aware VMEM budget (v5e/v6e: 128 MiB physical; v7x: 64 MiB/TC).
    vmem_cap = _vmem_capacity_bytes()
    if vmem_cap >= (96 << 20):
        budget_bytes, vmem_limit = 48 << 20, 96 << 20
    else:
        budget_bytes, vmem_limit = 20 << 20, 48 << 20

    G = _pick_block_channels(B, H, W, Ho, Wo, x.dtype.itemsize, budget_bytes)
    B_pad = -(-B // G) * G

    xf = x.reshape(B, H, W)
    if B_pad != B:
        xf = jnp.concatenate(
            [xf, jnp.zeros((B_pad - B, H, W), xf.dtype)], axis=0)

    kernel = functools.partial(_smooth_kernel, G=G, H=H, W=W, Ho=Ho, Wo=Wo)
    out = pl.pallas_call(
        kernel,
        out_shape=jax.ShapeDtypeStruct((B_pad, Ho, Wo), x.dtype),
        grid=(B_pad // G,),
        in_specs=[
            pl.BlockSpec((G, H, W), lambda i: (i, 0, 0)),   # channel-images
            pl.BlockSpec((W, Wo), lambda i: (0, 0)),        # Th (tiny, resident)
            pl.BlockSpec((Ho, H), lambda i: (0, 0)),        # Tv (tiny, resident)
        ],
        out_specs=pl.BlockSpec((G, Ho, Wo), lambda i: (i, 0, 0)),
        compiler_params=pltpu.CompilerParams(
            dimension_semantics=("parallel",),
            vmem_limit_bytes=vmem_limit,
        ),
    )(xf, th, tv)
    return out[:B].reshape(N, C, Ho, Wo)


if __name__ == "__main__":
    # Small, forward-consistent shapes: batch=2, channels=4, spatial=16x16,
    # kernel_size=11 so that padding=5 keeps the spatial size.
    N, C, H, W = 2, 4, 16, 16
    kernel_size, sigma, padding = 11, 2.0, 5

    key = jax.random.PRNGKey(0)
    x = jax.random.normal(key, (N, C, H, W), dtype=jnp.float32)

    out = gaussian_smoothing(x, kernel_size, sigma, padding=padding)
    out = jax.block_until_ready(out)

    # Reference: XLA grouped conv with the module's exact 2D weight
    # (same semantics as F.conv2d(groups=C, padding=5)).
    weight2d = make_gaussian_weight(C, kernel_size, sigma, dim=2)  # (C,1,K,K)
    ref = jax.lax.conv_general_dilated(
        x, weight2d, window_strides=(1, 1),
        padding=[(padding, padding), (padding, padding)],
        dimension_numbers=("NCHW", "OIHW", "NCHW"), feature_group_count=C,
    )
    assert out.shape == ref.shape == (N, C, H, W)
    np.testing.assert_allclose(np.asarray(out), np.asarray(ref),
                               rtol=1e-4, atol=1e-5)

    print("KERNEL_OK")
</pallas_src>

<mosaic_0001>
module attributes {stable_mosaic.version = 11 : i64} {
  func.func @_smooth_kernel(%arg0: i32, %arg1: memref<8x16x16xf32, #tpu.memory_space<vmem>>, %arg2: memref<16x16xf32, #tpu.memory_space<vmem>>, %arg3: memref<16x16xf32, #tpu.memory_space<vmem>>, %arg4: memref<8x16x16xf32, #tpu.memory_space<vmem>>) attributes {dimension_semantics = [#tpu.dimension_semantics<parallel>], iteration_bounds = array<i64: 1>, scalar_prefetch = 0 : i64, scratch_operands = 0 : i64, tpu.core_type = #tpu.core_type<tc>, window_params = [{transform_indices = @transform_0, window_bounds = array<i64: 8, 16, 16>}, {pipeline_mode = #tpu.pipeline_mode<synchronous>, transform_indices = @transform_1, window_bounds = array<i64: 16, 16>}, {pipeline_mode = #tpu.pipeline_mode<synchronous>, transform_indices = @transform_2, window_bounds = array<i64: 16, 16>}, {transform_indices = @transform_3, window_bounds = array<i64: 8, 16, 16>}]} {
    %c0 = arith.constant 0 : index
    %c0_0 = arith.constant 0 : index
    %c0_1 = arith.constant 0 : index
    %0 = vector.load %arg1[%c0, %c0_0, %c0_1] : memref<8x16x16xf32, #tpu.memory_space<vmem>>, vector<8x16x16xf32>
    %c0_2 = arith.constant 0 : index
    %c0_3 = arith.constant 0 : index
    %1 = vector.load %arg2[%c0_2, %c0_3] : memref<16x16xf32, #tpu.memory_space<vmem>>, vector<16x16xf32>
    %2 = vector.shape_cast %1 : vector<16x16xf32> to vector<1x16x16xf32>
    %3 = vector.broadcast %2 : vector<1x16x16xf32> to vector<8x16x16xf32>
    %c0_4 = arith.constant 0 : index
    %c0_5 = arith.constant 0 : index
    %4 = vector.load %arg3[%c0_4, %c0_5] : memref<16x16xf32, #tpu.memory_space<vmem>>, vector<16x16xf32>
    %5 = vector.shape_cast %4 : vector<16x16xf32> to vector<1x16x16xf32>
    %6 = vector.broadcast %5 : vector<1x16x16xf32> to vector<8x16x16xf32>
    "tpu.trace_start"() <{level = 10 : i32, message = "ghw,gwo->gho"}> : () -> ()
    %cst = arith.constant dense<0.000000e+00> : vector<8x16x16xf32>
    %7 = tpu.matmul %0, %3, %cst {dimension_numbers = #tpu.dot_dimension_numbers<[2], [1], [1], [2], [0, 0, 0, 1, 1, 2], [0], [0]>} : vector<8x16x16xf32>, vector<8x16x16xf32>, vector<8x16x16xf32> -> vector<8x16x16xf32>
    "tpu.trace_stop"() : () -> ()
    "tpu.trace_start"() <{level = 10 : i32, message = "grh,gho->gro"}> : () -> ()
    %cst_6 = arith.constant dense<0.000000e+00> : vector<8x16x16xf32>
    %8 = tpu.matmul %6, %7, %cst_6 {dimension_numbers = #tpu.dot_dimension_numbers<[2], [1], [1], [2], [0, 0, 0, 1, 1, 2], [0], [0]>} : vector<8x16x16xf32>, vector<8x16x16xf32>, vector<8x16x16xf32> -> vector<8x16x16xf32>
    "tpu.trace_stop"() : () -> ()
    %c0_7 = arith.constant 0 : index
    %c0_8 = arith.constant 0 : index
    %c0_9 = arith.constant 0 : index
    %9 = vector.load %arg4[%c0_7, %c0_8, %c0_9] : memref<8x16x16xf32, #tpu.memory_space<vmem>>, vector<8x16x16xf32>
    tpu.vector_store %arg4[%c0_7, %c0_8, %c0_9], %8 {strides = array<i32>} : memref<8x16x16xf32, #tpu.memory_space<vmem>>, vector<8x16x16xf32>,
    return
  }
  func.func @transform_0(%arg0: i32) -> (i32, i32, i32) {
    %c0_i32 = arith.constant 0 : i32
    %c0_i32_0 = arith.constant 0 : i32
    %c0_i32_1 = arith.constant 0 : i32
    return %arg0, %c0_i32, %c0_i32_0 : i32, i32, i32
  }
  func.func @transform_1(%arg0: i32) -> (i32, i32) {
    %c0_i32 = arith.constant 0 : i32
    %c0_i32_0 = arith.constant 0 : i32
    %c0_i32_1 = arith.constant 0 : i32
    return %c0_i32, %c0_i32_0 : i32, i32
  }
  func.func @transform_2(%arg0: i32) -> (i32, i32) {
    %c0_i32 = arith.constant 0 : i32
    %c0_i32_0 = arith.constant 0 : i32
    %c0_i32_1 = arith.constant 0 : i32
    return %c0_i32, %c0_i32_0 : i32, i32
  }
  func.func @transform_3(%arg0: i32) -> (i32, i32, i32) {
    %c0_i32 = arith.constant 0 : i32
    %c0_i32_0 = arith.constant 0 : i32
    %c0_i32_1 = arith.constant 0 : i32
    return %arg0, %c0_i32, %c0_i32_0 : i32, i32, i32
  }
}

</mosaic_0001>

<bundles_post_ra>
// kernel: tpu_custom_call.1
= control target key start
LH: loop header
LB: loop body
LE: loop exit
PB: predicated region body
PF: predicated region fallthrough
CT: control target
= control target key end

     0   :  { %8 = vsyncpa [#allocation3], 0  ;;  %s779_s0 = inlined_call_operand.hbm [shape: f32[8,16,16], index: 0, kind: input, shape index: {}]   ;;  %s780_s1 = inlined_call_operand.hbm [shape: f32[16,16], index: 1, kind: input, shape index: {}]   ;;  %s781_s2 = inlined_call_operand.hbm [shape: f32[16,16], index: 2, kind: input, shape index: {}]   ;;  %s782_s3 = inlined_call_operand.hbm [shape: f32[8,16,16], index: 3, kind: output, shape index: {}]  }
   0x1   :  { %9 = vsyncpa [#allocation6], 0 }
   0x2   :  { %10 = vsyncpa [#allocation4], 0  ;;  %s28_s14 = sshll.u32 %s780_s1, 4  ;;  %s681_s15 = smov [#allocation5]   ;;  %s29_s14 = int_to_ptr.hbm [resolvable:$true] %s28_s14 }
   0x3   :  { %s30_s16 = sshll.u32 %s681_s15, 4  ;;  %s15_s19 = sshll.u32 %s779_s0, 4  ;;  %s31_s16 = int_to_ptr.vmem [resolvable:$true] %s30_s16  ;;  %s16_s19 = int_to_ptr.hbm [resolvable:$true] %s15_s19 }
   0x4   :  { %s682_s20 = smov 128   ;;  %s683_s21 = smov 8  }
   0x5   :  { %36 = dma.hbm_to_vmem [thread:$0]  %s29_s14, 256, %s31_s16, [#allocation6], %s682_s20, %s682_s20, %s683_s21  }
   0x6   :  { %s684_s22 = smov [#allocation2]   ;;  %s41_s1 = sshll.u32 %s781_s2, 4  ;;  %s42_s1 = int_to_ptr.hbm [resolvable:$true] %s41_s1 }
   0x7   :  { %s17_s23 = sshll.u32 %s684_s22, 4  ;;  %s685_s0 = smov [#allocation7]   ;;  %s18_s23 = int_to_ptr.vmem [resolvable:$true] %s17_s23 }
   0x8   :  { %23 = dma.hbm_to_vmem [thread:$0]  %s16_s19, 2048, %s18_s23, [#allocation3], %s682_s20, %s682_s20, %s683_s21  }
   0x9   :  { %s43_s26 = sshll.u32 %s685_s0, 4  ;;  %s44_s26 = int_to_ptr.vmem [resolvable:$true] %s43_s26 }
   0xa   :  { %49 = dma.hbm_to_vmem [thread:$0]  %s42_s1, 256, %s44_s26, [#allocation6], %s682_s20, %s682_s20, %s683_s21  }
   0xb   :  { %675 = dma.done.wait [#allocation3], 2048  }
   0xc   :  { %676 = vsyncadd [#allocation3], 4294965248 }
   0xd   :  { %677 = dma.done.wait [#allocation6], 512  }
   0xe   :  { %678 = vsyncadd [#allocation6], 4294966784  ;;  %v79_v0 = vld [vmem:[#allocation5 + $0x8] sm:$0xff]  ;;  %v78_v1 = vld [vmem:[#allocation5] sm:$0xff]  ;;  %vm82_vm0 = vcmask 130048   ;;  %s686_s2 = smov [#allocation8]  }
   0xf   :  { %161 = vmatpush.msra.mxu2 %v79_v0  ;;  %190 = vmatpush.msra.mxu3 %v79_v0  ;;  %v66_v2 = vld [vmem:[#allocation2 + $0x20] sm:$0xff]  ;;  %v68_v3 = vld [vmem:[#allocation2 + $0x30] sm:$0xff]  ;;  %v67_v6 = vld [vmem:[#allocation2 + $0x28] sm:$0xff]  ;;  %s525_s27 = sshll.u32 %s686_s2, 4  ;;  %s527_s30 = sshll.u32 %s782_s3, 4  ;;  %s526_s27 = int_to_ptr.vmem [resolvable:$true] %s525_s27  ;;  %s528_s30 = int_to_ptr.hbm [resolvable:$true] %s527_s30 }
  0x10   :  { %103 = vmatpush.msra.mxu0 %v79_v0  ;;  %132 = vmatpush.msra.mxu1 %v79_v0  ;;  %v62_v4 = vld [vmem:[#allocation2] sm:$0xff]  ;;  %v64_v5 = vld [vmem:[#allocation2 + $0x10] sm:$0xff]  ;;  %v69_v7 = vld [vmem:[#allocation2 + $0x38] sm:$0xff] }
  0x11   :  { %162 = vmatpush.msra.mxu2 %v78_v1  ;;  %191 = vmatpush.msra.mxu3 %v78_v1  ;;  %v63_v8 = vld [vmem:[#allocation2 + $0x8] sm:$0xff]  ;;  %v65_v9 = vld [vmem:[#allocation2 + $0x18] sm:$0xff]  ;;  %v74_v10 = vld [vmem:[#allocation2 + $0x60] sm:$0xff] }
  0x12   :  { %545 = vmatmul.msk.f32.vlgmr.msra.gmra.mxu2 %vm82_vm0, %v66_v2  ;;  %547 = vmatmul.msk.f32.vlgmr.msra.gmra.mxu3 %vm82_vm0, %v68_v3  ;;  %v76_v11 = vld [vmem:[#allocation2 + $0x70] sm:$0xff]  ;;  %v70_v12 = vld [vmem:[#allocation2 + $0x40] sm:$0xff]  ;;  %v75_v14 = vld [vmem:[#allocation2 + $0x68] sm:$0xff] }
  0x13   :  { %104 = vmatpush.msra.mxu0 %v78_v1  ;;  %133 = vmatpush.msra.mxu1 %v78_v1  ;;  %v72_v13 = vld [vmem:[#allocation2 + $0x50] sm:$0xff]  ;;  %v77_v15 = vld [vmem:[#allocation2 + $0x78] sm:$0xff]  ;;  %v71_v16 = vld [vmem:[#allocation2 + $0x48] sm:$0xff] }
  0x14   :  { %541 = vmatmul.msk.f32.vlgmr.msra.gmra.mxu0 %vm82_vm0, %v62_v4  ;;  %543 = vmatmul.msk.f32.vlgmr.msra.gmra.mxu1 %vm82_vm0, %v64_v5  ;;  %v73_v17 = vld [vmem:[#allocation2 + $0x58] sm:$0xff]  ;;  %v80_v24 = vld [vmem:[#allocation7] sm:$0xff] }
  0x15   :  { %277 = vmatpush.msrb.mxu2 %v79_v0  ;;  %306 = vmatpush.msrb.mxu3 %v79_v0  ;;  %v81_v29 = vld [vmem:[#allocation7 + $0x8] sm:$0xff] }
  0x16   :  { %219 = vmatpush.msrb.mxu0 %v79_v0  ;;  %248 = vmatpush.msrb.mxu1 %v79_v0 }
  0x17   :  { %278 = vmatpush.msrb.mxu2 %v78_v1  ;;  %307 = vmatpush.msrb.mxu3 %v78_v1 }
  0x18   :  { %220 = vmatpush.msrb.mxu0 %v78_v1  ;;  %249 = vmatpush.msrb.mxu1 %v78_v1 }
  0x1a   :  { %546 = vmatmul.msk.f32.gmra.mxu2 %vm82_vm0, %v67_v6  ;;  %548 = vmatmul.msk.f32.gmra.mxu3 %vm82_vm0, %v69_v7 }
  0x1c   :  { %542 = vmatmul.msk.f32.gmra.mxu0 %vm82_vm0, %v63_v8  ;;  %544 = vmatmul.msk.f32.gmra.mxu1 %vm82_vm0, %v65_v9 }
  0x22   :  { %553 = vmatmul.msk.f32.vlgmr.msrb.gmra.mxu2 %vm82_vm0, %v74_v10  ;;  %555 = vmatmul.msk.f32.vlgmr.msrb.gmra.mxu3 %vm82_vm0, %v76_v11 }
  0x24   :  { %549 = vmatmul.msk.f32.vlgmr.msrb.gmra.mxu0 %vm82_vm0, %v70_v12  ;;  %551 = vmatmul.msk.f32.vlgmr.msrb.gmra.mxu1 %vm82_vm0, %v72_v13 }
  0x2a   :  { %554 = vmatmul.msk.f32.gmra.mxu2 %vm82_vm0, %v75_v14  ;;  %556 = vmatmul.msk.f32.gmra.mxu3 %vm82_vm0, %v77_v15 }
  0x2c   :  { %550 = vmatmul.msk.f32.gmra.mxu0 %vm82_vm0, %v71_v16  ;;  %552 = vmatmul.msk.f32.gmra.mxu1 %vm82_vm0, %v73_v17 }
  0x91   :  { %v106_v18 = vpop.f32.mrf.mxu0  ;;  %v135_v19 = vpop.f32.mrf.mxu1 }
  0x95   :  { %v164_v20 = vpop.f32.mrf.mxu2  ;;  %v193_v21 = vpop.f32.mrf.mxu3 }
  0x99   :  { %v109_v22 = vpop.f32.mrf.mxu0  ;;  %v138_v23 = vpop.f32.mrf.mxu1 }
  0x9a   :  { %335 = vmatpush.msra.mxu0 %v109_v22  ;;  %358 = vmatpush.msra.mxu1 %v138_v23 }
  0x9c   :  { %336 = vmatpush.msra.mxu0 %v106_v18  ;;  %359 = vmatpush.msra.mxu1 %v135_v19 }
  0x9d   :  { %v167_v25 = vpop.f32.mrf.mxu2  ;;  %v196_v26 = vpop.f32.mrf.mxu3  ;;  %557 = vmatmul.msk.f32.vlgmr.msra.gmra.mxu0 %vm82_vm0, %v80_v24  ;;  %559 = vmatmul.msk.f32.vlgmr.msra.gmra.mxu1 %vm82_vm0, %v80_v24 }
  0x9e   :  { %381 = vmatpush.msra.mxu2 %v167_v25  ;;  %404 = vmatpush.msra.mxu3 %v196_v26 }
  0xa0   :  { %382 = vmatpush.msra.mxu2 %v164_v20  ;;  %405 = vmatpush.msra.mxu3 %v193_v21 }
  0xa1   :  { %v222_v27 = vpop.f32.mrf.mxu0  ;;  %v251_v28 = vpop.f32.mrf.mxu1  ;;  %561 = vmatmul.msk.f32.vlgmr.msra.gmra.mxu2 %vm82_vm0, %v80_v24  ;;  %563 = vmatmul.msk.f32.vlgmr.msra.gmra.mxu3 %vm82_vm0, %v80_v24 }
  0xa5   :  { %v280_v30 = vpop.f32.mrf.mxu2  ;;  %v309_v31 = vpop.f32.mrf.mxu3  ;;  %558 = vmatmul.msk.f32.gmra.mxu0 %vm82_vm0, %v81_v29  ;;  %560 = vmatmul.msk.f32.gmra.mxu1 %vm82_vm0, %v81_v29 }
  0xa9   :  { %v225_v32 = vpop.f32.mrf.mxu0  ;;  %v254_v33 = vpop.f32.mrf.mxu1  ;;  %562 = vmatmul.msk.f32.gmra.mxu2 %vm82_vm0, %v81_v29  ;;  %564 = vmatmul.msk.f32.gmra.mxu3 %vm82_vm0, %v81_v29 }
  0xaa   :  { %427 = vmatpush.msrb.mxu0 %v225_v32  ;;  %450 = vmatpush.msrb.mxu1 %v254_v33 }
  0xac   :  { %428 = vmatpush.msrb.mxu0 %v222_v27  ;;  %451 = vmatpush.msrb.mxu1 %v251_v28 }
  0xad   :  { %v283_v34 = vpop.f32.mrf.mxu2  ;;  %v312_v35 = vpop.f32.mrf.mxu3  ;;  %565 = vmatmul.msk.f32.vlgmr.msrb.gmra.mxu0 %vm82_vm0, %v80_v24  ;;  %567 = vmatmul.msk.f32.vlgmr.msrb.gmra.mxu1 %vm82_vm0, %v80_v24 }
  0xae   :  { %473 = vmatpush.msrb.mxu2 %v283_v34  ;;  %496 = vmatpush.msrb.mxu3 %v312_v35 }
  0xb0   :  { %474 = vmatpush.msrb.mxu2 %v280_v30  ;;  %497 = vmatpush.msrb.mxu3 %v309_v31 }
  0xb1   :  { %569 = vmatmul.msk.f32.vlgmr.msrb.gmra.mxu2 %vm82_vm0, %v80_v24  ;;  %571 = vmatmul.msk.f32.vlgmr.msrb.gmra.mxu3 %vm82_vm0, %v80_v24 }
  0xb5   :  { %566 = vmatmul.msk.f32.gmra.mxu0 %vm82_vm0, %v81_v29  ;;  %568 = vmatmul.msk.f32.gmra.mxu1 %vm82_vm0, %v81_v29 }
  0xb9   :  { %570 = vmatmul.msk.f32.gmra.mxu2 %vm82_vm0, %v81_v29  ;;  %572 = vmatmul.msk.f32.gmra.mxu3 %vm82_vm0, %v81_v29 }
 0x11a   :  { %v338_v36 = vpop.f32.mrf.mxu0  ;;  %v361_v37 = vpop.f32.mrf.mxu1 }
 0x11b   :  { %505 = vst.msk [vmem:[#allocation8] sm:$0xff] %vm82_vm0, %v338_v36 }
 0x11c   :  { %507 = vst.msk [vmem:[#allocation8 + $0x10] sm:$0xff] %vm82_vm0, %v361_v37 }
 0x122   :  { %v341_v38 = vpop.f32.mrf.mxu0  ;;  %v364_v39 = vpop.f32.mrf.mxu1 }
 0x123   :  { %506 = vst.msk [vmem:[#allocation8 + $0x8] sm:$0xff] %vm82_vm0, %v341_v38 }
 0x124   :  { %v384_v40 = vpop.f32.mrf.mxu2  ;;  %v407_v41 = vpop.f32.mrf.mxu3  ;;  %508 = vst.msk [vmem:[#allocation8 + $0x18] sm:$0xff] %vm82_vm0, %v364_v39 }
 0x125   :  { %509 = vst.msk [vmem:[#allocation8 + $0x20] sm:$0xff] %vm82_vm0, %v384_v40 }
 0x126   :  { %511 = vst.msk [vmem:[#allocation8 + $0x30] sm:$0xff] %vm82_vm0, %v407_v41 }
 0x12a   :  { %v430_v42 = vpop.f32.mrf.mxu0  ;;  %v453_v43 = vpop.f32.mrf.mxu1 }
 0x12b   :  { %513 = vst.msk [vmem:[#allocation8 + $0x40] sm:$0xff] %vm82_vm0, %v430_v42 }
 0x12c   :  { %v387_v44 = vpop.f32.mrf.mxu2  ;;  %v410_v45 = vpop.f32.mrf.mxu3  ;;  %515 = vst.msk [vmem:[#allocation8 + $0x50] sm:$0xff] %vm82_vm0, %v453_v43 }
 0x12d   :  { %510 = vst.msk [vmem:[#allocation8 + $0x28] sm:$0xff] %vm82_vm0, %v387_v44 }
 0x12e   :  { %512 = vst.msk [vmem:[#allocation8 + $0x38] sm:$0xff] %vm82_vm0, %v410_v45 }
 0x132   :  { %v433_v46 = vpop.f32.mrf.mxu0  ;;  %v456_v47 = vpop.f32.mrf.mxu1 }
 0x133   :  { %514 = vst.msk [vmem:[#allocation8 + $0x48] sm:$0xff] %vm82_vm0, %v433_v46 }
 0x134   :  { %v476_v48 = vpop.f32.mrf.mxu2  ;;  %v499_v49 = vpop.f32.mrf.mxu3  ;;  %516 = vst.msk [vmem:[#allocation8 + $0x58] sm:$0xff] %vm82_vm0, %v456_v47 }
 0x135   :  { %517 = vst.msk [vmem:[#allocation8 + $0x60] sm:$0xff] %vm82_vm0, %v476_v48 }
 0x136   :  { %519 = vst.msk [vmem:[#allocation8 + $0x70] sm:$0xff] %vm82_vm0, %v499_v49 }
 0x13c   :  { %v479_v50 = vpop.f32.mrf.mxu2  ;;  %v502_v51 = vpop.f32.mrf.mxu3 }
 0x13d   :  { %518 = vst.msk [vmem:[#allocation8 + $0x68] sm:$0xff] %vm82_vm0, %v479_v50 }
 0x13e   :  { %520 = vst.msk [vmem:[#allocation8 + $0x78] sm:$0xff] %vm82_vm0, %v502_v51 }
 0x13f   :  { %533 = dma.vmem_to_hbm [thread:$0]  %s526_s27, 2048, %s528_s30, [#allocation4], %s682_s20, %s682_s20, %s683_s21  }
 0x140   :  { %679 = dma.done.wait [#allocation4], 2048  }
 0x141   :  { %680 = vsyncadd [#allocation4], 4294965248 }
 0x142   :  { %538 = vsyncpa [#allocation3], 1 }
 0x143   :  { %539 = vsyncpa [#allocation6], 1 }
 0x144   :  { %540 = vsyncpa [#allocation4], 1 }

</bundles_post_ra>
